<compile_context>
chip_gen: v5e
topology: v5e:2x2
jax: 0.10.0
libtpu: 0.0.40
codegen_flags: <defaults>
</compile_context>

<pallas_src>
import functools

import jax
import jax.numpy as jnp
from jax.experimental import pallas as pl
from jax.experimental.pallas import tpu as pltpu

NUM_FEATURES = 20          # len(self.features)
HIDDEN = (64, 32, 16)      # config['neurons_per_layer']
NUM_TARGETS = 1

F_PAD = 32                 # features padded 20 -> 32 (sublane aligned)
_PACK = 64                 # padded edge of each packed weight block (max dim = 64)
_LANE = 128                # TPU lane width; batch tiles are multiples of this


# ----------------------------------------------------------------------------
# Kernel: one batch tile, batch on lanes.
# ----------------------------------------------------------------------------
def _mlp_kernel(x_ref, w1_ref, w23_ref, w4_ref, b_ref, o_ref):
    """Fused 4-layer MLP forward on one (F_PAD, bn) batch tile.

    x_ref   : (F_PAD, bn)    bf16   input, batch on lanes, zero-padded features.
    w1_ref  : (64, F_PAD)    bf16   W1 (out, in) padded on the input dim.
    w23_ref : (2, 64, 64)    bf16   W2, W3 zero-padded to full 64x64 blocks.
    w4_ref  : (64, 1)        f32    W4^T as a column, zero-padded 16 -> 64.
    b_ref   : (4, 64, 1)     f32    b1..b3 as padded columns; b4 at [3, 0, 0].
    o_ref   : (1, bn)        f32    lane-dense output row.
    """
    bf16 = jnp.bfloat16

    x = x_ref[...]                                               # (32, bn) bf16

    # Layer 1: (64,32) @ (32,bn) -> (64,bn), f32 accumulation.
    h = jnp.dot(w1_ref[...], x, preferred_element_type=jnp.float32) + b_ref[0]
    h = jnp.maximum(h, 0.0)                                      # (64, bn) f32

    # Layer 2: padded rows (32..63) stay exactly 0 after bias-0 + relu.
    h = jnp.dot(w23_ref[0], h.astype(bf16),
                preferred_element_type=jnp.float32) + b_ref[1]
    h = jnp.maximum(h, 0.0)                                      # (64, bn)

    # Layer 3: padded rows (16..63) stay exactly 0.
    h = jnp.dot(w23_ref[1], h.astype(bf16),
                preferred_element_type=jnp.float32) + b_ref[2]
    h = jnp.maximum(h, 0.0)                                      # (64, bn)

    # Layer 4 (16 -> 1): VPU multiply + sublane reduction; padded rows are 0.
    out = jnp.sum(h * w4_ref[...], axis=0, keepdims=True) + b_ref[3, 0:1, :]
    o_ref[...] = out.astype(o_ref.dtype)                         # (1, bn)


# ----------------------------------------------------------------------------
# Parameter packing (done ONCE, outside the hot path).
# ----------------------------------------------------------------------------
def pack_params(params):
    """Pack PyTorch-convention params (w: (out,in), b: (out,)) into padded,
    VMEM-resident blocks. Call once and reuse for every forward."""
    f32, bf16 = jnp.float32, jnp.bfloat16
    h1, h2, h3 = HIDDEN

    w1p = jnp.zeros((h1, F_PAD), f32).at[:, :NUM_FEATURES].set(params["w1"])
    w1p = w1p.astype(bf16)                                       # (64, 32)

    w23p = jnp.zeros((2, _PACK, _PACK), f32)
    w23p = w23p.at[0, :h2, :h1].set(params["w2"])
    w23p = w23p.at[1, :h3, :h2].set(params["w3"])
    w23p = w23p.astype(bf16)                                     # (2, 64, 64)

    w4p = jnp.zeros((_PACK, 1), f32).at[:h3, 0].set(params["w4"][0])  # (64, 1)

    bp = jnp.zeros((4, _PACK, 1), f32)
    bp = bp.at[0, :h1, 0].set(params["b1"])
    bp = bp.at[1, :h2, 0].set(params["b2"])
    bp = bp.at[2, :h3, 0].set(params["b3"])
    bp = bp.at[3, 0, 0].set(params["b4"][0])                     # (4, 64, 1)

    return (w1p, w23p, w4p, bp)


# ----------------------------------------------------------------------------
# Tile selection helpers.
# ----------------------------------------------------------------------------
def _round_up(v, m):
    return ((v + m - 1) // m) * m


def _multi_core_chip():
    """True on chips with >1 TensorCore per device (v4 / v5p megacore, v7x)."""
    try:
        kind = jax.devices()[0].device_kind.lower()
    except Exception:  # pragma: no cover - defensive, e.g. no devices yet
        return False
    return any(tag in kind for tag in ("v4", "v5p", "v7", "7x"))


def _choose_block(padded_n, block_n, split_cores):
    """Largest 128-multiple divisor of padded_n, capped at block_n; on
    multi-core chips keep >=2 grid steps so both TensorCores get work."""
    c = padded_n // _LANE
    max_chunks = max(1, _round_up(max(block_n, _LANE), _LANE) // _LANE)
    if split_cores and c >= 2:
        max_chunks = min(max_chunks, max(1, c // 2))
    best = 1
    for cand in range(min(c, max_chunks), 0, -1):
        if c % cand == 0:
            best = cand
            break
    return best * _LANE


# ----------------------------------------------------------------------------
# Forward pass wrapper.
# ----------------------------------------------------------------------------
@functools.partial(jax.jit, static_argnames=("block_n",))
def dnn_forward(x, packed_params, *, block_n=2048):
    """Pallas forward pass of the DNN MLP.

    Args:
      x: (N, 20) float32 input batch (any N >= 1).
      packed_params: output of pack_params(params) (pack ONCE, reuse).
      block_n: maximum rows per batch tile (rounded to a multiple of 128).
    Returns:
      (N, 1) float32 predictions.
    """
    w1p, w23p, w4p, bp = packed_params
    n, f = x.shape
    assert f == NUM_FEATURES

    padded_n = _round_up(n, _LANE)                       # pad to <128 extra rows
    block = _choose_block(padded_n, block_n, _multi_core_chip())
    grid = (padded_n // block,)

    # Pad features 20 -> 32 (zeros), pad batch to padded_n, transpose so batch
    # is on lanes, and cast to bf16 (halves x DMA bytes).
    xp = jnp.pad(x, ((0, padded_n - n), (0, F_PAD - f)))
    xt = jnp.transpose(xp).astype(jnp.bfloat16)          # (F_PAD, padded_n)

    h1, h2, h3 = HIDDEN
    cost = pl.CostEstimate(
        flops=2 * padded_n * (F_PAD * h1 + _PACK * _PACK * 2 + _PACK),
        transcendentals=0,
        bytes_accessed=xt.size * 2 + padded_n * 4
        + w1p.size * 2 + w23p.size * 2 + w4p.size * 4 + bp.size * 4,
    )

    out_row = pl.pallas_call(
        _mlp_kernel,
        out_shape=jax.ShapeDtypeStruct((1, padded_n), jnp.float32),
        grid_spec=pltpu.PrefetchScalarGridSpec(
            num_scalar_prefetch=0,
            grid=grid,
            in_specs=[
                pl.BlockSpec((F_PAD, block), lambda i: (0, i)),        # x tile
                pl.BlockSpec((h1, F_PAD), lambda i: (0, 0)),           # W1 (resident)
                pl.BlockSpec((2, _PACK, _PACK), lambda i: (0, 0, 0)),  # W2,W3 (resident)
                pl.BlockSpec((_PACK, 1), lambda i: (0, 0)),            # W4 col (resident)
                pl.BlockSpec((4, _PACK, 1), lambda i: (0, 0, 0)),      # biases (resident)
            ],
            out_specs=pl.BlockSpec((1, block), lambda i: (0, i)),      # lane-dense row
        ),
        compiler_params=pltpu.CompilerParams(
            dimension_semantics=("parallel",),
        ),
        cost_estimate=cost,
    )(xt, w1p, w23p, w4p, bp)

    return out_row[0, :n].reshape(n, NUM_TARGETS)


# ----------------------------------------------------------------------------
# Init + references (PyTorch nn.Linear convention: w (out, in), b (out,)).
# ----------------------------------------------------------------------------
def init_params(key):
    """Uniform +-1/sqrt(fan_in) like PyTorch nn.Linear default init."""
    dims = (NUM_FEATURES,) + HIDDEN + (NUM_TARGETS,)
    params = {}
    for li, (fan_in, fan_out) in enumerate(zip(dims[:-1], dims[1:]), start=1):
        key, kw, kb = jax.random.split(key, 3)
        bound = 1.0 / (fan_in ** 0.5)
        params[f"w{li}"] = jax.random.uniform(
            kw, (fan_out, fan_in), jnp.float32, -bound, bound)
        params[f"b{li}"] = jax.random.uniform(
            kb, (fan_out,), jnp.float32, -bound, bound)
    return params


def dnn_forward_reference(x, params):
    """Pure-f32 plain-JAX reference of the module's forward pass."""
    h = jnp.maximum(x @ params["w1"].T + params["b1"], 0.0)
    h = jnp.maximum(h @ params["w2"].T + params["b2"], 0.0)
    h = jnp.maximum(h @ params["w3"].T + params["b3"], 0.0)
    return h @ params["w4"].T + params["b4"]


def dnn_forward_reference_bf16(x, params):
    """Reference that mimics the kernel's bf16-matmul / f32-accumulate numerics."""
    bf = jnp.bfloat16

    def lin(h, w, b):
        return jnp.dot(h.astype(bf), w.T.astype(bf),
                       preferred_element_type=jnp.float32) + b

    h = jnp.maximum(lin(x, params["w1"], params["b1"]), 0.0)
    h = jnp.maximum(lin(h, params["w2"], params["b2"]), 0.0)
    h = jnp.maximum(lin(h, params["w3"], params["b3"]), 0.0)
    # Final layer in exact f32 (matches the kernel's VPU multiply + reduce).
    return (jnp.sum(h * params["w4"][0], axis=-1, keepdims=True) + params["b4"])


if __name__ == "__main__":
    key = jax.random.PRNGKey(0)
    k_params, k_x = jax.random.split(key)

    params = init_params(k_params)
    packed = pack_params(params)   # packed ONCE, outside the per-call hot path

    # batch_size from config is 256; features = 20.
    x = jax.random.normal(k_x, (256, NUM_FEATURES), dtype=jnp.float32)
    y = jax.block_until_ready(dnn_forward(x, packed))
    assert y.shape == (256, NUM_TARGETS)

    y_mimic = dnn_forward_reference_bf16(x, params)   # same numerics as kernel
    y_f32 = dnn_forward_reference(x, params)          # original f32 semantics
    assert jnp.allclose(y, y_mimic, atol=2e-3, rtol=2e-3), "mismatch vs bf16 reference"
    assert jnp.allclose(y, y_f32, atol=1e-1, rtol=1e-1), "mismatch vs f32 reference"

    # Ragged batch exercises the pad-to-128 tail path.
    x2 = jax.random.normal(jax.random.PRNGKey(1), (200, NUM_FEATURES), jnp.float32)
    y2 = jax.block_until_ready(dnn_forward(x2, packed))
    assert y2.shape == (200, NUM_TARGETS)
    assert jnp.allclose(y2, dnn_forward_reference_bf16(x2, params), atol=2e-3, rtol=2e-3)

    print("KERNEL_OK")
</pallas_src>

<mosaic_0001>
module attributes {stable_mosaic.version = 11 : i64} {
  func.func @_mlp_kernel(%arg0: i32, %arg1: memref<32x256xbf16, #tpu.memory_space<vmem>>, %arg2: memref<64x32xbf16, #tpu.memory_space<vmem>>, %arg3: memref<2x64x64xbf16, #tpu.memory_space<vmem>>, %arg4: memref<64x1xf32, #tpu.memory_space<vmem>>, %arg5: memref<4x64x1xf32, #tpu.memory_space<vmem>>, %arg6: memref<1x256xf32, #tpu.memory_space<vmem>>) attributes {dimension_semantics = [#tpu.dimension_semantics<parallel>], iteration_bounds = array<i64: 1>, scalar_prefetch = 0 : i64, scratch_operands = 0 : i64, tpu.core_type = #tpu.core_type<tc>, window_params = [{transform_indices = @transform_0, window_bounds = array<i64: 32, 256>}, {pipeline_mode = #tpu.pipeline_mode<synchronous>, transform_indices = @transform_1, window_bounds = array<i64: 64, 32>}, {pipeline_mode = #tpu.pipeline_mode<synchronous>, transform_indices = @transform_2, window_bounds = array<i64: 2, 64, 64>}, {pipeline_mode = #tpu.pipeline_mode<synchronous>, transform_indices = @transform_3, window_bounds = array<i64: 64, 1>}, {pipeline_mode = #tpu.pipeline_mode<synchronous>, transform_indices = @transform_4, window_bounds = array<i64: 4, 64, 1>}, {transform_indices = @transform_5, window_bounds = array<i64: 1, 256>}]} {
    %c0 = arith.constant 0 : index
    %c0_0 = arith.constant 0 : index
    %0 = vector.load %arg1[%c0, %c0_0] : memref<32x256xbf16, #tpu.memory_space<vmem>>, vector<32x256xbf16>
    %c0_1 = arith.constant 0 : index
    %c0_2 = arith.constant 0 : index
    %1 = vector.load %arg2[%c0_1, %c0_2] : memref<64x32xbf16, #tpu.memory_space<vmem>>, vector<64x32xbf16>
    %cst = arith.constant dense<0.000000e+00> : vector<64x256xf32>
    %2 = tpu.matmul %1, %0, %cst {dimension_numbers = #tpu.dot_dimension_numbers<[1], [0], [0], [1], [0, 0, 1, 1], [], []>} : vector<64x32xbf16>, vector<32x256xbf16>, vector<64x256xf32> -> vector<64x256xf32>
    %c0_3 = arith.constant 0 : index
    %c0_4 = arith.constant 0 : index
    %c0_5 = arith.constant 0 : index
    %3 = vector.load %arg5[%c0_3, %c0_4, %c0_5] : memref<4x64x1xf32, #tpu.memory_space<vmem>>, vector<1x64x1xf32>
    %4 = vector.shape_cast %3 : vector<1x64x1xf32> to vector<64x1xf32>
    %5 = vector.broadcast %4 : vector<64x1xf32> to vector<64x256xf32>
    %6 = arith.addf %2, %5 : vector<64x256xf32>
    %cst_6 = arith.constant 0.000000e+00 : f32
    %7 = vector.broadcast %cst_6 : f32 to vector<64x256xf32>
    %8 = arith.maximumf %6, %7 : vector<64x256xf32>
    %c0_7 = arith.constant 0 : index
    %c0_8 = arith.constant 0 : index
    %c0_9 = arith.constant 0 : index
    %9 = vector.load %arg3[%c0_7, %c0_8, %c0_9] : memref<2x64x64xbf16, #tpu.memory_space<vmem>>, vector<1x64x64xbf16>
    %10 = vector.shape_cast %9 : vector<1x64x64xbf16> to vector<64x64xbf16>
    %11 = arith.truncf %8 : vector<64x256xf32> to vector<64x256xbf16>
    %cst_10 = arith.constant dense<0.000000e+00> : vector<64x256xf32>
    %12 = tpu.matmul %10, %11, %cst_10 {dimension_numbers = #tpu.dot_dimension_numbers<[1], [0], [0], [1], [0, 0, 1, 1], [], []>} : vector<64x64xbf16>, vector<64x256xbf16>, vector<64x256xf32> -> vector<64x256xf32>
    %c1 = arith.constant 1 : index
    %c0_11 = arith.constant 0 : index
    %c0_12 = arith.constant 0 : index
    %13 = vector.load %arg5[%c1, %c0_11, %c0_12] : memref<4x64x1xf32, #tpu.memory_space<vmem>>, vector<1x64x1xf32>
    %14 = vector.shape_cast %13 : vector<1x64x1xf32> to vector<64x1xf32>
    %15 = vector.broadcast %14 : vector<64x1xf32> to vector<64x256xf32>
    %16 = arith.addf %12, %15 : vector<64x256xf32>
    %cst_13 = arith.constant 0.000000e+00 : f32
    %17 = vector.broadcast %cst_13 : f32 to vector<64x256xf32>
    %18 = arith.maximumf %16, %17 : vector<64x256xf32>
    %c1_14 = arith.constant 1 : index
    %c0_15 = arith.constant 0 : index
    %c0_16 = arith.constant 0 : index
    %19 = vector.load %arg3[%c1_14, %c0_15, %c0_16] : memref<2x64x64xbf16, #tpu.memory_space<vmem>>, vector<1x64x64xbf16>
    %20 = vector.shape_cast %19 : vector<1x64x64xbf16> to vector<64x64xbf16>
    %21 = arith.truncf %18 : vector<64x256xf32> to vector<64x256xbf16>
    %cst_17 = arith.constant dense<0.000000e+00> : vector<64x256xf32>
    %22 = tpu.matmul %20, %21, %cst_17 {dimension_numbers = #tpu.dot_dimension_numbers<[1], [0], [0], [1], [0, 0, 1, 1], [], []>} : vector<64x64xbf16>, vector<64x256xbf16>, vector<64x256xf32> -> vector<64x256xf32>
    %c2 = arith.constant 2 : index
    %c0_18 = arith.constant 0 : index
    %c0_19 = arith.constant 0 : index
    %23 = vector.load %arg5[%c2, %c0_18, %c0_19] : memref<4x64x1xf32, #tpu.memory_space<vmem>>, vector<1x64x1xf32>
    %24 = vector.shape_cast %23 : vector<1x64x1xf32> to vector<64x1xf32>
    %25 = vector.broadcast %24 : vector<64x1xf32> to vector<64x256xf32>
    %26 = arith.addf %22, %25 : vector<64x256xf32>
    %cst_20 = arith.constant 0.000000e+00 : f32
    %27 = vector.broadcast %cst_20 : f32 to vector<64x256xf32>
    %28 = arith.maximumf %26, %27 : vector<64x256xf32>
    %c0_21 = arith.constant 0 : index
    %c0_22 = arith.constant 0 : index
    %29 = vector.load %arg4[%c0_21, %c0_22] : memref<64x1xf32, #tpu.memory_space<vmem>>, vector<64x1xf32>
    %30 = vector.broadcast %29 : vector<64x1xf32> to vector<64x256xf32>
    %31 = arith.mulf %28, %30 : vector<64x256xf32>
    %cst_23 = arith.constant dense<0.000000e+00> : vector<256xf32>
    %32 = vector.multi_reduction <add>, %31, %cst_23 [0] : vector<64x256xf32> to vector<256xf32>
    %33 = vector.shape_cast %32 : vector<256xf32> to vector<1x256xf32>
    %c3 = arith.constant 3 : index
    %c0_24 = arith.constant 0 : index
    %c0_25 = arith.constant 0 : index
    %34 = vector.load %arg5[%c3, %c0_24, %c0_25] : memref<4x64x1xf32, #tpu.memory_space<vmem>>, vector<1x1x1xf32>
    %35 = vector.shape_cast %34 : vector<1x1x1xf32> to vector<1x1xf32>
    %36 = vector.broadcast %35 : vector<1x1xf32> to vector<1x256xf32>
    %37 = arith.addf %33, %36 : vector<1x256xf32>
    %c0_26 = arith.constant 0 : index
    %c0_27 = arith.constant 0 : index
    %38 = vector.load %arg6[%c0_26, %c0_27] : memref<1x256xf32, #tpu.memory_space<vmem>>, vector<1x256xf32>
    tpu.vector_store %arg6[%c0_26, %c0_27], %37 {strides = array<i32>} : memref<1x256xf32, #tpu.memory_space<vmem>>, vector<1x256xf32>,
    return
  }
  func.func @transform_0(%arg0: i32) -> (i32, i32) {
    %c0_i32 = arith.constant 0 : i32
    %c0_i32_0 = arith.constant 0 : i32
    return %c0_i32, %arg0 : i32, i32
  }
  func.func @transform_1(%arg0: i32) -> (i32, i32) {
    %c0_i32 = arith.constant 0 : i32
    %c0_i32_0 = arith.constant 0 : i32
    %c0_i32_1 = arith.constant 0 : i32
    return %c0_i32, %c0_i32_0 : i32, i32
  }
  func.func @transform_2(%arg0: i32) -> (i32, i32, i32) {
    %c0_i32 = arith.constant 0 : i32
    %c0_i32_0 = arith.constant 0 : i32
    %c0_i32_1 = arith.constant 0 : i32
    %c0_i32_2 = arith.constant 0 : i32
    return %c0_i32, %c0_i32_0, %c0_i32_1 : i32, i32, i32
  }
  func.func @transform_3(%arg0: i32) -> (i32, i32) {
    %c0_i32 = arith.constant 0 : i32
    %c0_i32_0 = arith.constant 0 : i32
    %c0_i32_1 = arith.constant 0 : i32
    return %c0_i32, %c0_i32_0 : i32, i32
  }
  func.func @transform_4(%arg0: i32) -> (i32, i32, i32) {
    %c0_i32 = arith.constant 0 : i32
    %c0_i32_0 = arith.constant 0 : i32
    %c0_i32_1 = arith.constant 0 : i32
    %c0_i32_2 = arith.constant 0 : i32
    return %c0_i32, %c0_i32_0, %c0_i32_1 : i32, i32, i32
  }
  func.func @transform_5(%arg0: i32) -> (i32, i32) {
    %c0_i32 = arith.constant 0 : i32
    %c0_i32_0 = arith.constant 0 : i32
    return %c0_i32, %arg0 : i32, i32
  }
}

</mosaic_0001>

<bundles_post_ra>
// kernel: dnn_forward.1
= control target key start
LH: loop header
LB: loop body
LE: loop exit
PB: predicated region body
PF: predicated region fallthrough
CT: control target
= control target key end

     0   :  { %v843_v3 = vmov 0   ;;  %vm122_vm0 = vcmask 261120   ;;  %s1061_s0 = inlined_call_operand.vmem [shape: bf16[32,256], index: 0, kind: input, shape index: {}]   ;;  %s1062_s1 = inlined_call_operand.vmem [shape: bf16[64,32], index: 1, kind: input, shape index: {}]   ;;  %s1063_s2 = inlined_call_operand.vmem [shape: bf16[2,64,64], index: 2, kind: input, shape index: {}]   ;;  %s1064_s3 = inlined_call_operand.vmem [shape: f32[64,1], index: 3, kind: input, shape index: {}]   ;;  %s1065_s4 = inlined_call_operand.vmem [shape: f32[4,64,1], index: 4, kind: input, shape index: {}]   ;;  %s1066_s5 = inlined_call_operand.hbm [shape: f32[1,256], index: 5, kind: output, shape index: {}]  }
   0x1   :  { %v40_v0 = vld [vmem:[%s1065_s4 + $0x30] sm:$0xff]  ;;  %v38_v1 = vld [vmem:[%s1065_s4 + $0x20] sm:$0xff]  ;;  %816 = vset.pattern.permute.xlu2 %v843_v3  ;;  %815 = vset.pattern.permute.xlu1 %v843_v3  ;;  %v795_v5 = vld [vmem:[%s1061_s0 + $0x14] sm:$0xf0] }
   0x2   :  { %v36_v2 = vld [vmem:[%s1065_s4 + $0x10] sm:$0xff]  ;;  %814 = vset.pattern.permute.xlu0 %v843_v3  ;;  %64 = vperm.xlu1 %815, %v38_v1   ;;  %v707_v8 = vld [vmem:[%s1061_s0 + $0x18] sm:$0xf0]  ;;  %v697_v9 = vld [vmem:[%s1061_s0] sm:$0xf] }
   0x3   :  { %v705_v4 = vld [vmem:[%s1061_s0 + $0x10] sm:$0xf]  ;;  %v794_v6 = vld [vmem:[%s1061_s0 + $0x14] sm:$0xf]  ;;  %v793_v10 = vld [vmem:[%s1061_s0 + $0x4] sm:$0xf0]  ;;  %74 = vperm.xlu0 %814, %v40_v0   ;;  %54 = vperm.xlu2 %816, %v36_v2  }
   0x4   :  { %v706_v7 = vor.u32 %v795_v5, %v705_v4  ;;  %v710_v11 = vor.u32 %v794_v6, %v707_v8  ;;  %v792_v12 = vld [vmem:[%s1061_s0 + $0x4] sm:$0xf]  ;;  %v699_v13 = vld [vmem:[%s1061_s0 + $0x8] sm:$0xf0]  ;;  %v698_v14 = vor.u32 %v793_v10, %v697_v9  ;;  %v41_v17 = vld [vmem:[%s1065_s4 + $0x38] sm:$0xff] }
   0x5   :  { %v702_v15 = vor.u32 %v792_v12, %v699_v13  ;;  %v39_v16 = vld [vmem:[%s1065_s4 + $0x28] sm:$0xff]  ;;  %v37_v18 = vld [vmem:[%s1065_s4 + $0x18] sm:$0xff]  ;;  %v798_v19 = vld [vmem:[%s1062_s1 + $0x10] sm:$0xff] }
   0x6   :  { %808 = vmatpush.bf16.msra.mxu2 %v706_v7  ;;  %141 = vmatpush.bf16.msra.mxu0 %v706_v7  ;;  %v796_v20 = vld [vmem:[%s1062_s1] sm:$0xff] }
   0x7   :  { %810 = vmatpush.bf16.msra.mxu3 %v710_v11  ;;  %170 = vmatpush.bf16.msra.mxu1 %v710_v11 }
   0xa   :  { %809 = vmatpush.bf16.msra.mxu2 %v698_v14  ;;  %142 = vmatpush.bf16.msra.mxu0 %v698_v14 }
   0xb   :  { %811 = vmatpush.bf16.msra.mxu3 %v702_v15  ;;  %171 = vmatpush.bf16.msra.mxu1 %v702_v15 }
   0xc   :  { %10 = vsyncpa [#allocation3], 0  ;;  %69 = vperm.xlu1 %815, %v39_v16   ;;  %79 = vperm.xlu0 %814, %v41_v17   ;;  %v35_v21 = vld [vmem:[%s1065_s4 + $0x8] sm:$0xff]  ;;  %v725_v22 = vld [vmem:[%s1065_s4 + $0x70] sm:$0xff]  ;;  %vm294_vm1 = vcmask 523264   ;;  %s670_s19 = sshll.u32 %s1066_s5, 4  ;;  %s671_s19 = int_to_ptr.hbm [resolvable:$true] %s670_s19 }
   0xd   :  { %59 = vperm.xlu2 %816, %v37_v18   ;;  %713 = vmatmul.msk.bf16.vlgmr.msra.gmra.mxu2 %vm122_vm0, %v798_v19  ;;  %v34_v23 = vld [vmem:[%s1065_s4] sm:$0xff]  ;;  %v724_v25 = vld [vmem:[%s1065_s4 + $0x68] sm:$0xff]  ;;  %v726_v26 = vld [vmem:[%s1065_s4 + $0x78] sm:$0xff]  ;;  %vm655_vm2 = vcmask 1040384  }
   0xe   :  { %717 = vmatmul.msk.bf16.vlgmr.msra.gmra.mxu3 %vm122_vm0, %v798_v19  ;;  %711 = vmatmul.msk.bf16.vlgmr.msra.gmra.mxu0 %vm122_vm0, %v796_v20  ;;  %v723_v24 = vld [vmem:[%s1065_s4 + $0x60] sm:$0xff]  ;;  %v799_v27 = vld [vmem:[%s1062_s1 + $0x18] sm:$0xff]  ;;  %v797_v28 = vld [vmem:[%s1062_s1 + $0x8] sm:$0xff] }
   0xf   :  { %715 = vmatmul.msk.bf16.vlgmr.msra.gmra.mxu1 %vm122_vm0, %v796_v20  ;;  %v722_v29 = vld [vmem:[%s1065_s4 + $0x58] sm:$0xff]  ;;  %v719_v30 = vld [vmem:[%s1065_s4 + $0x40] sm:$0xff]  ;;  %v721_v31 = vld [vmem:[%s1065_s4 + $0x50] sm:$0xff] }
  0x10   :  { %v759_v32 = vld [vmem:[%s1065_s4 + $0x80] sm:$0xff]  ;;  %v760_v33 = vld [vmem:[%s1065_s4 + $0x88] sm:$0xff]  ;;  %v762_v35 = vld [vmem:[%s1065_s4 + $0x98] sm:$0xff] }
  0x11   :  { %v720_v34 = vld [vmem:[%s1065_s4 + $0x48] sm:$0xff]  ;;  %v763_v36 = vld [vmem:[%s1065_s4 + $0xa0] sm:$0xff]  ;;  %v761_v37 = vld [vmem:[%s1065_s4 + $0x90] sm:$0xff] }
  0x12   :  { %v554_v38 = vld [vmem:[%s1064_s3 + $0x8] sm:$0xff]  ;;  %v555_v39 = vld [vmem:[%s1064_s3 + $0x10] sm:$0xff]  ;;  %v553_v40 = vld [vmem:[%s1064_s3] sm:$0xff] }
  0x13   :  { %v556_v41 = vld [vmem:[%s1064_s3 + $0x18] sm:$0xff]  ;;  %v765_v42 = vld [vmem:[%s1065_s4 + $0xb0] sm:$0xff]  ;;  %v764_v43 = vld [vmem:[%s1065_s4 + $0xa8] sm:$0xff] }
  0x14   :  { %49 = vperm.xlu1 %815, %v35_v21   ;;  %44 = vperm.xlu0 %814, %v34_v23   ;;  %v766_v44 = vld [vmem:[%s1065_s4 + $0xb8] sm:$0xff]  ;;  %v558_v45 = vld [vmem:[%s1064_s3 + $0x28] sm:$0xff]  ;;  %v557_v46 = vld [vmem:[%s1064_s3 + $0x20] sm:$0xff] }
  0x15   :  { %266 = vperm.xlu2 %816, %v725_v22   ;;  %v560_v47 = vld [vmem:[%s1064_s3 + $0x38] sm:$0xff]  ;;  %v791_v48 = vld [vmem:[%s1065_s4 + $0xc0] sm:$0x1]  ;;  %v559_v49 = vld [vmem:[%s1064_s3 + $0x30] sm:$0xff] }
  0x1c   :  { %256 = vperm.xlu1 %815, %v723_v24   ;;  %271 = vperm.xlu0 %814, %v726_v26  }
  0x1d   :  { %261 = vperm.xlu2 %816, %v724_v25   ;;  %714 = vmatmul.msk.bf16.gmra.mxu2 %vm122_vm0, %v799_v27 }
  0x1e   :  { %718 = vmatmul.msk.bf16.gmra.mxu3 %vm122_vm0, %v799_v27  ;;  %712 = vmatmul.msk.bf16.gmra.mxu0 %vm122_vm0, %v797_v28 }
  0x1f   :  { %716 = vmatmul.msk.bf16.gmra.mxu1 %vm122_vm0, %v797_v28 }
  0x24   :  { %251 = vperm.xlu1 %815, %v722_v29   ;;  %246 = vperm.xlu0 %814, %v721_v31  }
  0x25   :  { %236 = vperm.xlu2 %816, %v719_v30  }
  0x2c   :  { %409 = vperm.xlu1 %815, %v759_v32   ;;  %241 = vperm.xlu0 %814, %v720_v34  }
  0x2d   :  { %414 = vperm.xlu2 %816, %v760_v33  }
  0x34   :  { %424 = vperm.xlu1 %815, %v762_v35   ;;  %419 = vperm.xlu0 %814, %v761_v37  }
  0x35   :  { %429 = vperm.xlu2 %816, %v763_v36  }
  0x3c   :  { %568 = vperm.xlu1 %815, %v554_v38   ;;  %563 = vperm.xlu0 %814, %v553_v40  }
  0x3d   :  { %573 = vperm.xlu2 %816, %v555_v39  }
  0x44   :  { %578 = vperm.xlu1 %815, %v556_v41   ;;  %434 = vperm.xlu0 %814, %v764_v43  }
  0x45   :  { %439 = vperm.xlu2 %816, %v765_v42  }
  0x4c   :  { %444 = vperm.xlu1 %815, %v766_v44   ;;  %583 = vperm.xlu0 %814, %v557_v46  }
  0x4d   :  { %588 = vperm.xlu2 %816, %v558_v45  }
  0x54   :  { %598 = vperm.xlu1 %815, %v560_v47   ;;  %593 = vperm.xlu0 %814, %v559_v49  }
  0x55   :  { %647 = vperm.xlu2 %816, %v791_v48  }
  0x5d   :  { %v55_v0 = vpop.permute.xlu2 %54 }
  0x67   :  { %v60_v19 = vpop.permute.xlu2 %59 }
  0x74   :  { %v65_v59 = vpop.permute.xlu1 %64 }
  0x75   :  { %v75_v58 = vpop.permute.xlu0 %74 }
  0x7e   :  { %v80_v1 = vpop.permute.xlu0 %79  ;;  %v70_v2 = vpop.permute.xlu1 %69 }
  0x86   :  { %v45_v28 = vpop.permute.xlu0 %44  ;;  %v50_v31 = vpop.permute.xlu1 %49 }
  0x8b   :  { %v144_v50 = vpop.f32.mrf.mxu0 }
  0x8c   :  { %v173_v51 = vpop.f32.mrf.mxu1  ;;  %v145_v32 = vadd.f32 %v144_v50, %v45_v28  ;;  %v800_v50 = vld [vmem:[%s1063_s2] sm:$0xff] }
  0x8d   :  { %v174_v33 = vadd.f32 %v173_v51, %v45_v28  ;;  %v801_v51 = vld [vmem:[%s1063_s2 + $0x8] sm:$0xff] }
  0x8e   :  { %v193_v42 = vmax.f32 %v145_v32, 0.0 }
  0x8f   :  { %v194_v43 = vmax.f32 %v174_v33, 0.0 }
  0x90   :  { %v154_v52 = vpop.f32.mrf.mxu2 }
  0x91   :  { %v183_v53 = vpop.f32.mrf.mxu3  ;;  %v155_v11 = vadd.f32 %v154_v52, %v65_v59  ;;  %v802_v52 = vld [vmem:[%s1063_s2 + $0x10] sm:$0xff] }
  0x92   :  { %v184_v12 = vadd.f32 %v183_v53, %v65_v59  ;;  %v803_v53 = vld [vmem:[%s1063_s2 + $0x18] sm:$0xff] }
  0x93   :  { %v146_v54 = vpop.f32.mrf.mxu0  ;;  %v201_v29 = vmax.f32 %v155_v11, 0.0 }
  0x94   :  { %v175_v55 = vpop.f32.mrf.mxu1  ;;  %v202_v30 = vmax.f32 %v184_v12, 0.0  ;;  %v147_v34 = vadd.f32 %v146_v54, %v50_v31 }
  0x95   :  { %v176_v35 = vadd.f32 %v175_v55, %v50_v31 }
  0x96   :  { %v195_v44 = vmax.f32 %v147_v34, 0.0 }
  0x97   :  { %v196_v45 = vmax.f32 %v176_v35, 0.0 }
  0x98   :  { %v156_v56 = vpop.f32.mrf.mxu2  ;;  %v217_v48 = vpack.c.bf16 %v195_v44, %v193_v42 }
  0x99   :  { %v185_v57 = vpop.f32.mrf.mxu3  ;;  %v157_v5 = vadd.f32 %v156_v56, %v70_v2  ;;  %v218_v49 = vpack.c.bf16 %v196_v45, %v194_v43 }
  0x9a   :  { %v186_v6 = vadd.f32 %v185_v57, %v70_v2  ;;  %v272_v2 = vpop.permute.xlu0 %271 }
  0x9b   :  { %v149_v60 = vpop.f32.mrf.mxu0  ;;  %v203_v20 = vmax.f32 %v157_v5, 0.0 }
  0x9c   :  { %v178_v61 = vpop.f32.mrf.mxu1  ;;  %v204_v21 = vmax.f32 %v186_v6, 0.0  ;;  %v150_v22 = vadd.f32 %v149_v60, %v55_v0  ;;  %v257_v6 = vpop.permute.xlu1 %256 }
  0x9d   :  { %v179_v23 = vadd.f32 %v178_v61, %v55_v0  ;;  %v221_v36 = vpack.c.bf16 %v203_v20, %v201_v29 }
  0x9e   :  { %v222_v37 = vpack.c.bf16 %v204_v21, %v202_v30  ;;  %v197_v38 = vmax.f32 %v150_v22, 0.0 }
  0x9f   :  { %v198_v39 = vmax.f32 %v179_v23, 0.0 }
  0xa0   :  { %v159_v62 = vpop.f32.mrf.mxu2 }
  0xa1   :  { %v188_v63 = vpop.f32.mrf.mxu3  ;;  %v160_v3 = vadd.f32 %v159_v62, %v75_v58 }
  0xa2   :  { %v189_v4 = vadd.f32 %v188_v63, %v75_v58 }
  0xa3   :  { %v151_v13 = vpop.f32.mrf.mxu0  ;;  %v205_v15 = vmax.f32 %v160_v3, 0.0  ;;  %v267_v3 = vpop.permute.xlu2 %266 }
  0xa4   :  { %v180_v14 = vpop.f32.mrf.mxu1  ;;  %v206_v16 = vmax.f32 %v189_v4, 0.0  ;;  %v152_v24 = vadd.f32 %v151_v13, %v60_v19 }
  0xa5   :  { %v181_v25 = vadd.f32 %v180_v14, %v60_v19  ;;  %v252_v19 = vpop.permute.xlu1 %251 }
  0xa6   :  { %v199_v40 = vmax.f32 %v152_v24, 0.0 }
  0xa7   :  { %v200_v41 = vmax.f32 %v181_v25, 0.0 }
  0xa8   :  { %v161_v7 = vpop.f32.mrf.mxu2  ;;  %v219_v46 = vpack.c.bf16 %v199_v40, %v197_v38 }
  0xa9   :  { %v190_v8 = vpop.f32.mrf.mxu3  ;;  %v162_v9 = vadd.f32 %v161_v7, %v80_v1  ;;  %v220_v47 = vpack.c.bf16 %v200_v41, %v198_v39  ;;  %v247_v7 = vpop.permute.xlu0 %246 }
  0xaa   :  { %v191_v10 = vadd.f32 %v190_v8, %v80_v1 }
  0xab   :  { %v207_v17 = vmax.f32 %v162_v9, 0.0  ;;  %v262_v8 = vpop.permute.xlu2 %261 }
  0xac   :  { %v208_v18 = vmax.f32 %v191_v10, 0.0 }
  0xad   :  { %v223_v26 = vpack.c.bf16 %v207_v17, %v205_v15 }
  0xae   :  { %v224_v27 = vpack.c.bf16 %v208_v18, %v206_v16 }
  0xaf   :  { %311 = vmatpush.bf16.msrb.mxu2 %v223_v26 }
  0xb0   :  { %340 = vmatpush.bf16.msrb.mxu3 %v224_v27 }
  0xb1   :  { %v242_v30 = vpop.permute.xlu0 %241 }
  0xb3   :  { %312 = vmatpush.bf16.msrb.mxu2 %v221_v36  ;;  %v237_v41 = vpop.permute.xlu2 %236 }
  0xb4   :  { %341 = vmatpush.bf16.msrb.mxu3 %v222_v37 }
  0xb7   :  { %313 = vmatpush.bf16.msrb.mxu2 %v219_v46 }
  0xb8   :  { %342 = vmatpush.bf16.msrb.mxu3 %v220_v47 }
  0xbb   :  { %314 = vmatpush.bf16.msrb.mxu2 %v217_v48 }
  0xbc   :  { %343 = vmatpush.bf16.msrb.mxu3 %v218_v49 }
  0xbe   :  { %743 = vmatmul.msk.bf16.vlgmr.msrb.gmra.mxu2 %vm294_vm1, %v800_v50 }
  0xbf   :  { %747 = vmatmul.msk.bf16.vlgmr.msrb.gmra.mxu3 %vm294_vm1, %v800_v50 }
  0xce   :  { %744 = vmatmul.msk.bf16.gmra.mxu2 %vm294_vm1, %v801_v51 }
  0xcf   :  { %748 = vmatmul.msk.bf16.gmra.mxu3 %vm294_vm1, %v801_v51 }
  0xde   :  { %745 = vmatmul.msk.bf16.gmra.mxu2 %vm294_vm1, %v802_v52 }
  0xdf   :  { %749 = vmatmul.msk.bf16.gmra.mxu3 %vm294_vm1, %v802_v52 }
  0xee   :  { %746 = vmatmul.msk.bf16.gmra.mxu2 %vm294_vm1, %v803_v53 }
  0xef   :  { %750 = vmatmul.msk.bf16.gmra.mxu3 %vm294_vm1, %v803_v53 }
 0x141   :  { %v316_v54 = vpop.f32.mrf.mxu2 }
 0x142   :  { %v345_v55 = vpop.f32.mrf.mxu3  ;;  %v317_v42 = vadd.f32 %v316_v54, %v237_v41  ;;  %v805_v54 = vld [vmem:[%s1063_s2 + $0x28] sm:$0xff] }
 0x143   :  { %v346_v43 = vadd.f32 %v345_v55, %v237_v41  ;;  %v806_v55 = vld [vmem:[%s1063_s2 + $0x30] sm:$0xff] }
 0x144   :  { %v365_v50 = vmax.f32 %v317_v42, 0.0 }
 0x145   :  { %v366_v51 = vmax.f32 %v346_v43, 0.0 }
 0x149   :  { %v318_v56 = vpop.f32.mrf.mxu2 }
 0x14a   :  { %v347_v57 = vpop.f32.mrf.mxu3  ;;  %v319_v35 = vadd.f32 %v318_v56, %v242_v30  ;;  %v804_v56 = vld [vmem:[%s1063_s2 + $0x20] sm:$0xff] }
 0x14b   :  { %v348_v36 = vadd.f32 %v347_v57, %v242_v30  ;;  %v807_v57 = vld [vmem:[%s1063_s2 + $0x38] sm:$0xff]  ;;  %s844_s2 = smov [#allocation2]  }
 0x14c   :  { %v367_v46 = vmax.f32 %v319_v35, 0.0  ;;  %s668_s17 = sshll.u32 %s844_s2, 4  ;;  %s669_s17 = int_to_ptr.vmem [resolvable:$true] %s668_s17 }
 0x14d   :  { %v368_v47 = vmax.f32 %v348_v36, 0.0 }
 0x14e   :  { %v390_v52 = vpack.c.bf16 %v367_v46, %v365_v50 }
 0x14f   :  { %v391_v53 = vpack.c.bf16 %v368_v47, %v366_v51 }
 0x151   :  { %v321_v58 = vpop.f32.mrf.mxu2 }
 0x152   :  { %v350_v59 = vpop.f32.mrf.mxu3  ;;  %v322_v31 = vadd.f32 %v321_v58, %v247_v7 }
 0x153   :  { %v351_v32 = vadd.f32 %v350_v59, %v247_v7 }
 0x154   :  { %v369_v44 = vmax.f32 %v322_v31, 0.0 }
 0x155   :  { %v370_v45 = vmax.f32 %v351_v32, 0.0 }
 0x159   :  { %v323_v60 = vpop.f32.mrf.mxu2 }
 0x15a   :  { %v352_v61 = vpop.f32.mrf.mxu3  ;;  %v324_v24 = vadd.f32 %v323_v60, %v252_v19 }
 0x15b   :  { %v353_v25 = vadd.f32 %v352_v61, %v252_v19 }
 0x15c   :  { %v371_v37 = vmax.f32 %v324_v24, 0.0 }
 0x15d   :  { %v372_v38 = vmax.f32 %v353_v25, 0.0 }
 0x15e   :  { %v392_v48 = vpack.c.bf16 %v371_v37, %v369_v44 }
 0x15f   :  { %v393_v49 = vpack.c.bf16 %v372_v38, %v370_v45 }
 0x161   :  { %v326_v62 = vpop.f32.mrf.mxu2 }
 0x162   :  { %v355_v63 = vpop.f32.mrf.mxu3  ;;  %v327_v17 = vadd.f32 %v326_v62, %v257_v6  ;;  %v410_v62 = vpop.permute.xlu1 %409 }
 0x163   :  { %v356_v18 = vadd.f32 %v355_v63, %v257_v6  ;;  %v415_v63 = vpop.permute.xlu2 %414 }
 0x164   :  { %v373_v33 = vmax.f32 %v327_v17, 0.0 }
 0x165   :  { %v374_v34 = vmax.f32 %v356_v18, 0.0 }
 0x169   :  { %v328_v0 = vpop.f32.mrf.mxu2 }
 0x16a   :  { %v357_v1 = vpop.f32.mrf.mxu3  ;;  %v329_v13 = vadd.f32 %v328_v0, %v262_v8  ;;  %v420_v0 = vpop.permute.xlu0 %419 }
 0x16b   :  { %v358_v14 = vadd.f32 %v357_v1, %v262_v8 }
 0x16c   :  { %v375_v26 = vmax.f32 %v329_v13, 0.0 }
 0x16d   :  { %v376_v27 = vmax.f32 %v358_v14, 0.0 }
 0x16e   :  { %v394_v39 = vpack.c.bf16 %v375_v26, %v373_v33 }
 0x16f   :  { %v395_v40 = vpack.c.bf16 %v376_v27, %v374_v34 }
 0x171   :  { %v331_v4 = vpop.f32.mrf.mxu2 }
 0x172   :  { %v360_v5 = vpop.f32.mrf.mxu3  ;;  %v332_v9 = vadd.f32 %v331_v4, %v267_v3  ;;  %v430_v4 = vpop.permute.xlu2 %429 }
 0x173   :  { %v361_v10 = vadd.f32 %v360_v5, %v267_v3  ;;  %v425_v3 = vpop.permute.xlu1 %424  ;;  %v564_v7 = vpop.permute.xlu0 %563 }
 0x174   :  { %v377_v20 = vmax.f32 %v332_v9, 0.0 }
 0x175   :  { %v378_v21 = vmax.f32 %v361_v10, 0.0 }
 0x179   :  { %v333_v11 = vpop.f32.mrf.mxu2 }
 0x17a   :  { %v362_v12 = vpop.f32.mrf.mxu3  ;;  %v334_v15 = vadd.f32 %v333_v11, %v272_v2  ;;  %v574_v11 = vpop.permute.xlu2 %573 }
 0x17b   :  { %v363_v16 = vadd.f32 %v362_v12, %v272_v2  ;;  %v569_v8 = vpop.permute.xlu1 %568  ;;  %v435_v12 = vpop.permute.xlu0 %434 }
 0x17c   :  { %v379_v22 = vmax.f32 %v334_v15, 0.0 }
 0x17d   :  { %v380_v23 = vmax.f32 %v363_v16, 0.0 }
 0x17e   :  { %v396_v28 = vpack.c.bf16 %v379_v22, %v377_v20 }
 0x17f   :  { %v397_v29 = vpack.c.bf16 %v380_v23, %v378_v21 }
 0x180   :  { %483 = vmatpush.bf16.msrb.mxu0 %v396_v28 }
 0x181   :  { %512 = vmatpush.bf16.msrb.mxu1 %v397_v29 }
 0x182   :  { %v440_v28 = vpop.permute.xlu2 %439 }
 0x183   :  { %v579_v15 = vpop.permute.xlu1 %578  ;;  %v584_v33 = vpop.permute.xlu0 %583 }
 0x184   :  { %484 = vmatpush.bf16.msrb.mxu0 %v394_v39 }
 0x185   :  { %513 = vmatpush.bf16.msrb.mxu1 %v395_v40 }
 0x188   :  { %485 = vmatpush.bf16.msrb.mxu0 %v392_v48 }
 0x189   :  { %514 = vmatpush.bf16.msrb.mxu1 %v393_v49 }
 0x18b   :  { %v445_v50 = vpop.permute.xlu1 %444 }
 0x18c   :  { %486 = vmatpush.bf16.msrb.mxu0 %v390_v52 }
 0x18d   :  { %515 = vmatpush.bf16.msrb.mxu1 %v391_v53 }
 0x18f   :  { %783 = vmatmul.msk.bf16.vlgmr.msrb.gmra.mxu0 %vm294_vm1, %v804_v56 }
 0x190   :  { %787 = vmatmul.msk.bf16.vlgmr.msrb.gmra.mxu1 %vm294_vm1, %v804_v56 }
 0x19f   :  { %784 = vmatmul.msk.bf16.gmra.mxu0 %vm294_vm1, %v805_v54 }
 0x1a0   :  { %788 = vmatmul.msk.bf16.gmra.mxu1 %vm294_vm1, %v805_v54 }
 0x1af   :  { %785 = vmatmul.msk.bf16.gmra.mxu0 %vm294_vm1, %v806_v55 }
 0x1b0   :  { %789 = vmatmul.msk.bf16.gmra.mxu1 %vm294_vm1, %v806_v55 }
 0x1bf   :  { %786 = vmatmul.msk.bf16.gmra.mxu0 %vm294_vm1, %v807_v57 }
 0x1c0   :  { %790 = vmatmul.msk.bf16.gmra.mxu1 %vm294_vm1, %v807_v57 }
 0x20c   :  { %v488_v58 = vpop.f32.mrf.mxu0 }
 0x20d   :  { %v517_v59 = vpop.f32.mrf.mxu1  ;;  %v489_v16 = vadd.f32 %v488_v58, %v410_v62 }
 0x20e   :  { %v518_v17 = vadd.f32 %v517_v59, %v410_v62 }
 0x20f   :  { %v537_v26 = vmax.f32 %v489_v16, 0.0 }
 0x210   :  { %v538_v27 = vmax.f32 %v518_v17, 0.0  ;;  %v599_v17 = vpop.permute.xlu1 %598 }
 0x211   :  { %v601_v38 = vmul.f32 %v564_v7, %v537_v26 }
 0x212   :  { %v602_v39 = vmul.f32 %v564_v7, %v538_v27 }
 0x214   :  { %v490_v60 = vpop.f32.mrf.mxu0 }
 0x215   :  { %v519_v61 = vpop.f32.mrf.mxu1  ;;  %v491_v13 = vadd.f32 %v490_v60, %v415_v63 }
 0x216   :  { %v520_v14 = vadd.f32 %v519_v61, %v415_v63  ;;  %v589_v63 = vpop.permute.xlu2 %588 }
 0x217   :  { %v539_v22 = vmax.f32 %v491_v13, 0.0 }
 0x218   :  { %v540_v23 = vmax.f32 %v520_v14, 0.0 }
 0x219   :  { %v603_v34 = vmul.f32 %v569_v8, %v539_v22 }
 0x21a   :  { %v604_v35 = vmul.f32 %v569_v8, %v540_v23 }
 0x21b   :  { %v617_v51 = vadd.f32 %v603_v34, %v601_v38 }
 0x21c   :  { %v493_v1 = vpop.f32.mrf.mxu0  ;;  %v630_v52 = vadd.f32 %v604_v35, %v602_v39 }
 0x21d   :  { %v522_v2 = vpop.f32.mrf.mxu1  ;;  %v494_v18 = vadd.f32 %v493_v1, %v420_v0 }
 0x21e   :  { %v523_v19 = vadd.f32 %v522_v2, %v420_v0  ;;  %v594_v2 = vpop.permute.xlu0 %593 }
 0x21f   :  { %v541_v29 = vmax.f32 %v494_v18, 0.0 }
 0x220   :  { %v542_v30 = vmax.f32 %v523_v19, 0.0 }
 0x221   :  { %v605_v42 = vmul.f32 %v574_v11, %v541_v29 }
 0x222   :  { %v606_v43 = vmul.f32 %v574_v11, %v542_v30 }
 0x223   :  { %v618_v57 = vadd.f32 %v617_v51, %v605_v42 }
 0x224   :  { %v495_v5 = vpop.f32.mrf.mxu0  ;;  %v631_v58 = vadd.f32 %v630_v52, %v606_v43 }
 0x225   :  { %v524_v6 = vpop.f32.mrf.mxu1  ;;  %v496_v24 = vadd.f32 %v495_v5, %v425_v3 }
 0x226   :  { %v525_v25 = vadd.f32 %v524_v6, %v425_v3 }
 0x227   :  { %v543_v36 = vmax.f32 %v496_v24, 0.0 }
 0x228   :  { %v544_v37 = vmax.f32 %v525_v25, 0.0 }
 0x229   :  { %v607_v53 = vmul.f32 %v579_v15, %v543_v36  ;;  %v658_v36 = vlaneseq }
 0x22a   :  { %v608_v56 = vmul.f32 %v579_v15, %v544_v37  ;;  %v648_v37 = vpop.permute.xlu2 %647 }
 0x22b   :  { %v619_v0 = vadd.f32 %v618_v57, %v607_v53  ;;  %vm660_vm3 = vcmp.lt.s32.totalorder %v658_v36, 256 }
 0x22c   :  { %v498_v9 = vpop.f32.mrf.mxu0  ;;  %v632_v1 = vadd.f32 %v631_v58, %v608_v56 }
 0x22d   :  { %v527_v10 = vpop.f32.mrf.mxu1  ;;  %v499_v31 = vadd.f32 %v498_v9, %v430_v4 }
 0x22e   :  { %v528_v32 = vadd.f32 %v527_v10, %v430_v4 }
 0x22f   :  { %v545_v44 = vmax.f32 %v499_v31, 0.0 }
 0x230   :  { %v546_v45 = vmax.f32 %v528_v32, 0.0 }
 0x231   :  { %v609_v59 = vmul.f32 %v584_v33, %v545_v44 }
 0x232   :  { %v610_v60 = vmul.f32 %v584_v33, %v546_v45 }
 0x233   :  { %v620_v5 = vadd.f32 %v619_v0, %v609_v59 }
 0x234   :  { %v500_v20 = vpop.f32.mrf.mxu0  ;;  %v633_v6 = vadd.f32 %v632_v1, %v610_v60 }
 0x235   :  { %v529_v21 = vpop.f32.mrf.mxu1  ;;  %v501_v40 = vadd.f32 %v500_v20, %v435_v12 }
 0x236   :  { %v530_v41 = vadd.f32 %v529_v21, %v435_v12 }
 0x237   :  { %v547_v54 = vmax.f32 %v501_v40, 0.0 }
 0x238   :  { %v548_v55 = vmax.f32 %v530_v41, 0.0 }
 0x239   :  { %v611_v3 = vmul.f32 %v589_v63, %v547_v54 }
 0x23a   :  { %v612_v4 = vmul.f32 %v589_v63, %v548_v55 }
 0x23b   :  { %v621_v13 = vadd.f32 %v620_v5, %v611_v3 }
 0x23c   :  { %v503_v46 = vpop.f32.mrf.mxu0  ;;  %v634_v14 = vadd.f32 %v633_v6, %v612_v4 }
 0x23d   :  { %v532_v47 = vpop.f32.mrf.mxu1  ;;  %v504_v48 = vadd.f32 %v503_v46, %v440_v28 }
 0x23e   :  { %v533_v49 = vadd.f32 %v532_v47, %v440_v28 }
 0x23f   :  { %v549_v61 = vmax.f32 %v504_v48, 0.0 }
 0x240   :  { %v550_v62 = vmax.f32 %v533_v49, 0.0 }
 0x241   :  { %v613_v9 = vmul.f32 %v594_v2, %v549_v61 }
 0x242   :  { %v614_v10 = vmul.f32 %v594_v2, %v550_v62 }
 0x243   :  { %v622_v18 = vadd.f32 %v621_v13, %v613_v9 }
 0x244   :  { %v505_v7 = vpop.f32.mrf.mxu0  ;;  %v635_v19 = vadd.f32 %v634_v14, %v614_v10 }
 0x245   :  { %v534_v8 = vpop.f32.mrf.mxu1  ;;  %v506_v11 = vadd.f32 %v505_v7, %v445_v50 }
 0x246   :  { %v535_v12 = vadd.f32 %v534_v8, %v445_v50 }
 0x247   :  { %v551_v15 = vmax.f32 %v506_v11, 0.0 }
 0x248   :  { %v552_v16 = vmax.f32 %v535_v12, 0.0 }
 0x249   :  { %v615_v20 = vmul.f32 %v599_v17, %v551_v15 }
 0x24a   :  { %v616_v21 = vmul.f32 %v599_v17, %v552_v16 }
 0x24b   :  { %v623_v22 = vadd.f32 %v622_v18, %v615_v20 }
 0x24c   :  { %v636_v23 = vadd.f32 %v635_v19, %v616_v21 }
 0x24d   :  { %v624_v24 = vrot.slane %v623_v22, 4 }
 0x24e   :  { %v637_v25 = vrot.slane %v636_v23, 4 }
 0x24f   :  { %v625_v26 = vadd.f32 %v624_v24, %v623_v22 }
 0x250   :  { %v638_v27 = vadd.f32 %v637_v25, %v636_v23 }
 0x251   :  { %v626_v28 = vrot.slane %v625_v26, 2 }
 0x252   :  { %v639_v29 = vrot.slane %v638_v27, 2 }
 0x253   :  { %v627_v30 = vadd.f32 %v626_v28, %v625_v26 }
 0x254   :  { %v640_v31 = vadd.f32 %v639_v29, %v638_v27 }
 0x255   :  { %v628_v32 = vrot.slane %v627_v30, 1 }
 0x256   :  { %v641_v33 = vrot.slane %v640_v31, 1 }
 0x257   :  { %v629_v35 = vadd.f32 %v628_v32, %v627_v30 }
 0x258   :  { %v642_v34 = vadd.f32 %v641_v33, %v640_v31 }
 0x259   :  { %v650_v39 = vadd.f32 %v648_v37, %v629_v35 }
 0x25a   :  { %v651_v38 = vadd.f32 %v648_v37, %v642_v34 }
 0x25c   :  { %v654_v40 = vrot.slane %v651_v38, 7 }
 0x25e   :  { %v656_v41 = vsel %vm655_vm2, %v650_v39, %v654_v40 }
 0x25f   :  { %662 = vst.msk [vmem:[#allocation2] sm:$0x3] %vm660_vm3, %v656_v41 }
 0x260   :  { %673 = dma.vmem_to_hbm [thread:$0]  %s669_s17, 32, %s671_s19, [#allocation3]  }
 0x261   :  { %841 = dma.done.wait [#allocation3], 32  }
 0x262   :  { %842 = vsyncadd [#allocation3], 4294967264 }
 0x263   :  { %678 = vsyncpa [#allocation3], 1 }

</bundles_post_ra>
